<compile_context>
chip_gen: v5e
topology: v5e:2x2
jax: 0.10.0
libtpu: 0.0.40
codegen_flags: <defaults>
</compile_context>

<pallas_src>
import jax
import jax.numpy as jnp
from jax import lax
from jax.experimental import pallas as pl
from jax.experimental.pallas import tpu as pltpu


def _logreg_kernel(x_ref, w_ref, b_ref, o_ref):
    # x_ref: (TB, D) VMEM  -- batch tile, double-buffered by Pallas
    # w_ref: (8, D)  VMEM  -- lane-dense, row-replicated weight, grid-resident
    # b_ref: (1, 1)  SMEM  -- scalar bias on the scalar path
    # o_ref: (1, TB) VMEM  -- lane-dense output block (unmasked stores)
    logits8 = lax.dot_general(
        w_ref[...], x_ref[...],
        dimension_numbers=(((1,), (1,)), ((), ())),      # contract D with D
        preferred_element_type=jnp.float32)              # (8, TB) f32 on MXU
    # All 8 rows are identical (weight is row-replicated); keep row 0.
    o_ref[...] = jax.nn.sigmoid(logits8[0:1, :] + b_ref[0, 0])


def _round_up(n, m):
    return ((n + m - 1) // m) * m


def _pick_batch_tile(batch_rows, d, x_itemsize, vmem_budget_bytes=28 << 20):
    """Largest multiple-of-128 batch tile whose *padded* VMEM use fits budget.

    Double-buffered per-step VMEM, with sublane/lane padding accounted for:
      x   : 2 * tb * d * x_itemsize
      out : 2 * 8 * tb * 4      ((1, tb) block sublane-pads to 8 rows)
      w   : 2 * 8 * d * 4       (grid-resident (8, d) block, tiny)
    28 MiB of buffers (+ compiler scratch, under a 48 MiB limit) is safe on
    v5e/v6e (128 MiB VMEM) and on v7x (64 MiB VMEM).
    """
    fixed = 2 * 8 * d * 4
    per_row = 2 * d * x_itemsize + 2 * 8 * 4
    tb = max(0, vmem_budget_bytes - fixed) // per_row
    tb = min(tb, 8192, _round_up(max(batch_rows, 1), 128))
    tb = max(128, (tb // 128) * 128)
    return tb


def logistic_regression_forward(x, weight, bias, *, batch_tile=None,
                                core_parallel=False):
    """sigmoid(x @ weight.T + bias).

    x:      (B, D) f32 or bf16 (bf16 halves HBM traffic; accumulation is f32)
    weight: (1, D) f32  (PyTorch nn.Linear(D, 1) layout)
    bias:   (1,)   f32
    returns (B, 1) f32
    """
    B, D = x.shape
    if x.dtype not in (jnp.float32, jnp.bfloat16):
        x = x.astype(jnp.float32)
    compute_dtype = x.dtype
    itemsize = jnp.dtype(compute_dtype).itemsize

    # Lane-dense, row-replicated weight (same VMEM footprint as the sublane
    # padding of a (1, D) block; avoids a degenerate M=1 MXU shape).
    w8 = jnp.broadcast_to(weight.reshape(1, D), (8, D)).astype(compute_dtype)
    b2d = bias.reshape(1, 1).astype(jnp.float32)

    if batch_tile is None:
        tb = _pick_batch_tile(B, D, itemsize)
    else:
        tb = max(128, _round_up(int(batch_tile), 128))
    tb = min(tb, _round_up(B, 128))

    num_tiles = pl.cdiv(B, tb)         # ragged final block handled by Pallas
    b_round = num_tiles * tb

    cost = pl.CostEstimate(
        flops=2 * b_round * D,
        transcendentals=b_round,
        bytes_accessed=itemsize * B * D + 4 * (8 * D + 1 + b_round),
    )

    # PARALLEL is safe everywhere; CORE_PARALLEL engages both v7x TensorCores'
    # DMA engines on this bandwidth-bound kernel (opt-in).
    dim_sem = (pltpu.CORE_PARALLEL if core_parallel else pltpu.PARALLEL,)

    out = pl.pallas_call(
        _logreg_kernel,
        out_shape=jax.ShapeDtypeStruct((1, b_round), jnp.float32),
        grid_spec=pl.GridSpec(
            grid=(num_tiles,),
            in_specs=[
                pl.BlockSpec((tb, D), lambda i: (i, 0)),             # x tiled
                pl.BlockSpec((8, D), lambda i: (0, 0)),              # w resident
                pl.BlockSpec(memory_space=pltpu.MemorySpace.SMEM),   # bias scalar
            ],
            out_specs=pl.BlockSpec((1, tb), lambda i: (0, i)),       # lane-dense
        ),
        compiler_params=pltpu.CompilerParams(
            dimension_semantics=dim_sem,
            # Above the 16/32 MiB scoped defaults, below v7x's 64 MiB physical.
            vmem_limit_bytes=48 * 1024 * 1024,
        ),
        cost_estimate=cost,
    )(x, w8, b2d)

    return out[0, :B].reshape(B, 1)


if __name__ == "__main__":
    key = jax.random.PRNGKey(0)
    kx, kw, kb = jax.random.split(key, 3)

    # Small shapes consistent with the module: a batch of flattened one-hot
    # champion vectors, Linear(input_dim, 1) parameters.  batch=300 with
    # batch_tile=128 gives 3 grid steps and a ragged final x block, exercising
    # the masked-last-block path (no jnp.pad copy anywhere).
    batch, input_dim = 300, 256
    x = jax.random.normal(kx, (batch, input_dim), dtype=jnp.float32)
    weight = jax.random.normal(kw, (1, input_dim), dtype=jnp.float32) * 0.05
    bias = jax.random.normal(kb, (1,), dtype=jnp.float32) * 0.05

    out = jax.block_until_ready(
        logistic_regression_forward(x, weight, bias, batch_tile=128))
    ref = jax.nn.sigmoid(x @ weight.T + bias)
    assert out.shape == (batch, 1)
    assert jnp.allclose(out, ref, atol=1e-5, rtol=1e-5)

    # Default (auto) tile, single ragged block for a small batch.
    x_small = jax.random.normal(kx, (20, input_dim), dtype=jnp.float32)
    out_s = jax.block_until_ready(
        logistic_regression_forward(x_small, weight, bias))
    ref_s = jax.nn.sigmoid(x_small @ weight.T + bias)
    assert out_s.shape == (20, 1)
    assert jnp.allclose(out_s, ref_s, atol=1e-5, rtol=1e-5)

    # bf16 fast path: x consumed as bf16 (half the HBM traffic), f32 accumulate.
    x_bf16 = x.astype(jnp.bfloat16)
    out_b = jax.block_until_ready(
        logistic_regression_forward(x_bf16, weight, bias, batch_tile=128))
    ref_b = jax.nn.sigmoid(x_bf16.astype(jnp.float32) @ weight.T + bias)
    assert out_b.shape == (batch, 1)
    assert jnp.allclose(out_b, ref_b, atol=2e-2, rtol=2e-2)

    print("KERNEL_OK")
</pallas_src>

<mosaic_0001>
module attributes {stable_mosaic.version = 11 : i64} {
  func.func @_logreg_kernel(%arg0: i32, %arg1: memref<128x256xf32, #tpu.memory_space<vmem>>, %arg2: memref<8x256xf32, #tpu.memory_space<vmem>>, %arg3: memref<1x1xf32, #tpu.memory_space<smem>>, %arg4: memref<1x128xf32, #tpu.memory_space<vmem>>) attributes {dimension_semantics = [#tpu.dimension_semantics<parallel>], iteration_bounds = array<i64: 3>, scalar_prefetch = 0 : i64, scratch_operands = 0 : i64, tpu.core_type = #tpu.core_type<tc>, window_params = [{transform_indices = @transform_0, window_bounds = array<i64: 128, 256>}, {pipeline_mode = #tpu.pipeline_mode<synchronous>, transform_indices = @transform_1, window_bounds = array<i64: 8, 256>}, {transform_indices = @transform_2, window_bounds = array<i64: 1, 1>}, {transform_indices = @transform_3, window_bounds = array<i64: 1, 128>}]} {
    %c0 = arith.constant 0 : index
    %c0_0 = arith.constant 0 : index
    %0 = vector.load %arg2[%c0, %c0_0] : memref<8x256xf32, #tpu.memory_space<vmem>>, vector<8x256xf32>
    %c0_1 = arith.constant 0 : index
    %c0_2 = arith.constant 0 : index
    %1 = vector.load %arg1[%c0_1, %c0_2] : memref<128x256xf32, #tpu.memory_space<vmem>>, vector<128x256xf32>
    %cst = arith.constant dense<0.000000e+00> : vector<8x128xf32>
    %2 = tpu.matmul %0, %1, %cst {dimension_numbers = #tpu.dot_dimension_numbers<[1], [1], [0], [0], [0, 0, 1, 0], [], []>} : vector<8x256xf32>, vector<128x256xf32>, vector<8x128xf32> -> vector<8x128xf32>
    %3 = vector.extract_strided_slice %2 {offsets = [0, 0], sizes = [1, 128], strides = [1, 1]} : vector<8x128xf32> to vector<1x128xf32>
    %c0_3 = arith.constant 0 : index
    %c0_4 = arith.constant 0 : index
    %4 = memref.load %arg3[%c0_3, %c0_4] : memref<1x1xf32, #tpu.memory_space<smem>>
    %5 = vector.broadcast %4 : f32 to vector<1x128xf32>
    %6 = arith.addf %3, %5 : vector<1x128xf32>
    %7 = arith.negf %6 : vector<1x128xf32>
    %8 = math.exp %7 : vector<1x128xf32>
    %cst_5 = arith.constant 1.000000e+00 : f32
    %9 = vector.broadcast %cst_5 : f32 to vector<1x128xf32>
    %10 = arith.addf %9, %8 : vector<1x128xf32>
    %11 = arith.divf %9, %10 : vector<1x128xf32>
    %c0_6 = arith.constant 0 : index
    %c0_7 = arith.constant 0 : index
    %12 = vector.load %arg4[%c0_6, %c0_7] : memref<1x128xf32, #tpu.memory_space<vmem>>, vector<1x128xf32>
    tpu.vector_store %arg4[%c0_6, %c0_7], %11 {strides = array<i32>} : memref<1x128xf32, #tpu.memory_space<vmem>>, vector<1x128xf32>,
    return
  }
  func.func @transform_0(%arg0: i32) -> (i32, i32) {
    %c0_i32 = arith.constant 0 : i32
    %c0_i32_0 = arith.constant 0 : i32
    return %arg0, %c0_i32 : i32, i32
  }
  func.func @transform_1(%arg0: i32) -> (i32, i32) {
    %c0_i32 = arith.constant 0 : i32
    %c0_i32_0 = arith.constant 0 : i32
    %c0_i32_1 = arith.constant 0 : i32
    return %c0_i32, %c0_i32_0 : i32, i32
  }
  func.func @transform_2(%arg0: i32) -> (i32, i32) {
    %c0_i32 = arith.constant 0 : i32
    %c0_i32_0 = arith.constant 0 : i32
    %c0_i32_1 = arith.constant 0 : i32
    return %c0_i32, %c0_i32_0 : i32, i32
  }
  func.func @transform_3(%arg0: i32) -> (i32, i32) {
    %c0_i32 = arith.constant 0 : i32
    %c0_i32_0 = arith.constant 0 : i32
    return %c0_i32, %arg0 : i32, i32
  }
}

</mosaic_0001>

<bundles_post_ra>
// kernel: tpu_custom_call.1
= control target key start
LH: loop header
LB: loop body
LE: loop exit
PB: predicated region body
PF: predicated region fallthrough
CT: control target
= control target key end

     0   :  { %s855_s0 = inlined_call_operand.hbm [shape: f32[300,256], index: 0, kind: input, shape index: {}]   ;;  %s856_s1 = inlined_call_operand.hbm [shape: f32[8,256], index: 1, kind: input, shape index: {}]   ;;  %s857_s2 = inlined_call_operand.<no memory space> [shape: f32[1,1], index: 2, kind: input, shape index: {}]   ;;  %s858_s3 = inlined_call_operand.hbm [shape: f32[1,384], index: 3, kind: output, shape index: {}]  }
   0x1   :  { %8 = sst [smem:[#allocation2]] %s857_s2 }
   0x2   :  { %9 = vsyncpa [#allocation4], 0 }
   0x3   :  { %11 = vsyncpa [#allocation4 + $0x1], 0 }
   0x4   :  { %12 = vsyncpa [#allocation7], 0 }
   0x5   :  { %13 = vsyncpa [#allocation5], 0 }
   0x6   :  { %15 = vsyncpa [#allocation5 + $0x1], 0  ;;  %s654_s14 = smov 0   ;;  %s656_s15 = smov 0  }
   0x7   :  { %s658_s16 = smov 0   ;;  %s660_s17 = smov 0  }
   0x8 LB: > { %s675_s2 = sadd.s32 4294967295, %s625_s17   ;;  %s407_s18 = sadd.s32 4294967294, %s625_s17   ;;  %s625_s17 = sphi %s660_s17, %s872_s17   ;;  %s621_s16 = sphi %s658_s16, %s871_s16   ;;  %s617_s15 = sphi %s656_s15, %s870_s15   ;;  %s613_s14 = sphi %s654_s14, %s869_s14  }
   0x9   : > { %s679_s19 = sadd.s32 1, %s625_s17   ;;  %s28_s20 = sadd.s32 1, %s621_s16 }
   0xa   : > { %s25_s21 = ssub.s32 %s625_s17, %s679_s19  ;;  %p35_p0 = scmp.ne.s32.totalorder %s621_s16, %s617_s15 }
   0xb   : > { %p26_p1 = scmp.eq.s32.totalorder %s25_s21, 0  ;;  %p36_p2 = scmp.eq.s32.totalorder %s625_s17, 0 }
   0xc   : > { %p41_p3 = scmp.ne.s32.totalorder %s617_s15, %s613_s14  ;;  %p859_p4 = scmp.eq.s32.totalorder %s675_s2, 0 }
   0xd   : > { %s691_s22 = scalar_select %p26_p1, %s621_s16, %s28_s20  }
   0xe   : > { %p693_p5 = por %p36_p2, %p35_p0  ;;  %p699_p6 = por %p859_p4, %p41_p3 }
   0xf   : > { %p107_p7 = scmp.eq.s32.totalorder %s675_s2, 2  ;;  %p113_p8 = scmp.eq.s32.totalorder %s407_s18, 2 }
  0x10   : > { %p408_p9 = scmp.ge.s32.totalorder %s625_s17, 1  ;;  %p120_p10 = scmp.lt.s32.totalorder %s625_s17, 4 }
  0x11   : > { %p706_p11 = por %p107_p7, %p35_p0  ;;  %p710_p12 = por %p113_p8, %p41_p3 }
  0x12   : > { %p714_p13 = pnand %p408_p9, %p120_p10  ;;  %s132_s30 = sshll.u32 %s856_s1, 4  ;;  %s133_s30 = int_to_ptr.hbm [resolvable:$true] %s132_s30 }
  0x13   : > { %s863_s26 = scalar_select %p710_p12, 1, 0 }
  0x14   : > { %p436_p1 = pneg %p714_p13  ;;  %s627_s4 = smov [#allocation6]  }
  0x15   : > { %s134_s5 = sshll.u32 %s627_s4, 4  ;;  %p410_p2 = scmp.ge.s32.totalorder %s625_s17, 3  ;;  %s135_s5 = int_to_ptr.vmem [resolvable:$true] %s134_s5 }
  0x16   : > { %p437_p0 = pnand %p436_p1, %p859_p4 }
  0x17   : > { %144 = sbr.rel (%p410_p2) target bundleno = 64 (0x40), region = 24 }
  0x18   : > { %439 = dma.hbm_to_vmem [thread:$0]  (!%p437_p0), %s133_s30, 256, %s135_s5, [#allocation7]  }
  0x1c   : > { %147 = sbr.rel (!%p693_p5) target bundleno = 64 (0x40), region = 28  ;;  %s148_s6 = sand.u32 (%p693_p5), 1, %s621_s16  }
  0x1d   : > { %s412_s7 = sshll.u32 (%p693_p5), %s625_s17, 4  ;;  %s411_s8 = sshll.u32 (%p693_p5), %s148_s6, 8 }
  0x1e   : > { %s154_s9 = ssub.s32 (%p693_p5), 38, %s412_s7  ;;  %s733_s13 = scalar_lea.sflag (%p693_p5), [#allocation4], %s148_s6 }
  0x1f   : > { %p155_p3 = scmp.lt.s32.totalorder (%p693_p5), %s154_s9, 16  ;;  %s152_s18 = scalar_lea.vmem (%p693_p5), [#allocation3], %s411_s8 }
  0x21   : > { %s874_s9 = smov (!%p155_p3, %s154_s9), 16 }
  0x22   : > { %s426_s10 = sshll.u32 %s874_s9, 4 }
  0x23   : > { %s159_s11 = ssub.s32 256, %s426_s10 }
  0x24   : > { %s160_s12 = sshll.u32 %s159_s11, 4 }
  0x25   : > { %161 = vsyncadd %s733_s13, %s160_s12  ;;  %p736_p5 = scmp.ne.s32.totalorder %s426_s10, 0  ;;  %s428_s21 = sshll.u32 %s625_s17, 8 }
  0x26   : > { %s165_s29 = scalar_lea.hbm %s855_s0, %s428_s21  ;;  %s744_s30 = sshll.u32 %s152_s18, 4  ;;  %s170_s30 = int_to_ptr.vmem [resolvable:$true] %s744_s30 }
  0x27   : > { %s167_s4 = sshll.u32 %s165_s29, 4  ;;  %s419_s5 = sshll.u32 %s874_s9, 8  ;;  %s747_s4 = int_to_ptr.hbm [resolvable:$true] %s167_s4 }
  0x28   : > { %s516_s6 = sshra.s32 %s747_s4, 4  ;;  %s518_s7 = sshrl.u32 %s419_s5, 4  ;;  %s517_s6 = int_to_ptr.hbm [resolvable:$true] %s516_s6 }
  0x29   : > { %s523_s8 = scalar_lea.hbm %s517_s6, %s518_s7  ;;  %s527_s12 = scalar_lea.hbm %s855_s0, 608 }
  0x2a   : > { %p524_p7 = scmp.ne.s32.totalorder %s517_s6, %s523_s8  ;;  %p528_p10 = scmp.lt.s32.totalorder %s517_s6, %s855_s0 }
  0x2b   : > { %p529_p1 = scmp.lt.s32.totalorder %s527_s12, %s523_s8 }
  0x2c   : > { %p525_p8 = pnand %p524_p7, %p736_p5 }
  0x2d   : > { %p530_p0 = por %p529_p1, %p528_p10 }
  0x2e   : > { %p526_p9 = pneg %p525_p8 }
  0x30   : > { %p531_p2 = pnand %p530_p0, %p526_p9 }
  0x32   : > { %534 = shalt.err (!%p531_p2)
}
  0x33   : > { %s535_s23 = sshra.s32 %s170_s30, 4  ;;  %s628_s29 = smov [#allocation3]   ;;  %s536_s23 = int_to_ptr.vmem [resolvable:$true] %s535_s23 }
  0x34   : > { %s542_s28 = scalar_lea.vmem %s536_s23, %s518_s7  ;;  %s546_s10 = scalar_lea.vmem %s628_s29, 512 }
  0x35   : > { %p543_p3 = scmp.ne.s32.totalorder %s536_s23, %s542_s28  ;;  %p548_p4 = scmp.lt.s32.totalorder %s546_s10, %s542_s28 }
  0x37   : > { %p544_p7 = pnand %p543_p3, %p736_p5 }
  0x39   : > { %p545_p8 = pneg %p544_p7 }
  0x3b   : > { %p550_p12 = pnand %p548_p4, %p545_p8 }
  0x3d   : > { %553 = shalt.err (!%p550_p12)
}
  0x3e   : > { %s629_s6 = smov 256   ;;  %s630_s8 = smov 16  }
  0x3f   : > { %175 = dma.hbm_to_vmem [thread:$0]  (%p736_p5), %s747_s4, %s419_s5, %s170_s30, %s733_s13, %s629_s6, %s629_s6, %s630_s8  }
  0x40 PF: > { %181 = sbr.rel (%p714_p13) target bundleno = 298 (0x12a), region = 32  ;;  %s776_s7 = sand.u32 (!%p714_p13), 1, %s617_s15  }
  0x41   : > { %s421_s11 = sshll.u32 (!%p714_p13), %s776_s7, 8  ;;  %s184_s12 = scalar_lea.sflag (!%p714_p13), [#allocation4], %s776_s7 }
  0x42   : > { %s780_s18 = scalar_lea.vmem (!%p714_p13), [#allocation3], %s421_s11 }
  0x45   : > { %600 = dma.done.wait (%p699_p6), %s184_s12, 4096  }
  0x46   : > { %602 = vsyncadd (%p699_p6), %s184_s12, 4294963200  ;;  %p866_p4 = scmp.eq.s32.totalorder %s675_s2, 0 }
  0x48   : > { %604 = dma.done.wait (%p866_p4), [#allocation7], 256   ;;  %p867_p12 = pmov %p866_p4 }
  0x49   : > { %v253_v0 = vld [vmem:[%s780_s18 + $0xf0] sm:$0xff]  ;;  %v254_v1 = vld [vmem:[%s780_s18 + $0xf8] sm:$0xff]  ;;  %v251_v2 = vld [vmem:[%s780_s18 + $0xe0] sm:$0xff]  ;;  %s295_s24 = sld [smem:[#allocation2]]  ;;  %s327_s13 = scalar_lea.hbm %s858_s3, %s675_s2 }
  0x4a   : > { %606 = vsyncadd (%p867_p12), [#allocation7], 4294967040  ;;  %255 = vmatpush.xpose.msra.mxu0 %v253_v0  ;;  %275 = vmatpush.xpose.msra.mxu1 %v254_v1  ;;  %v252_v3 = vld [vmem:[%s780_s18 + $0xe8] sm:$0xff]  ;;  %v249_v4 = vld [vmem:[%s780_s18 + $0xd0] sm:$0xff]  ;;  %s214_s20 = scalar_lea.vmem [#allocation8], %s776_s7  ;;  %s331_s4 = sshll.u32 %s327_s13, 4  ;;  %s332_s4 = int_to_ptr.hbm [resolvable:$true] %s331_s4 }
  0x4b   : > { %v250_v5 = vld [vmem:[%s780_s18 + $0xd8] sm:$0xff]  ;;  %v247_v6 = vld [vmem:[%s780_s18 + $0xc0] sm:$0xff]  ;;  %v248_v7 = vld [vmem:[%s780_s18 + $0xc8] sm:$0xff]  ;;  %s329_s30 = sshll.u32 %s214_s20, 4  ;;  %s319_s2 = scalar_lea.sflag [#allocation5], %s776_s7  ;;  %s330_s30 = int_to_ptr.vmem [resolvable:$true] %s329_s30 }
  0x4c   : > { %v245_v8 = vld [vmem:[%s780_s18 + $0xb0] sm:$0xff]  ;;  %v246_v9 = vld [vmem:[%s780_s18 + $0xb8] sm:$0xff]  ;;  %v243_v10 = vld [vmem:[%s780_s18 + $0xa0] sm:$0xff]  ;;  %s569_s5 = sshra.s32 %s332_s4, 4  ;;  %s575_s29 = scalar_lea.hbm %s858_s3, 3  ;;  %s570_s5 = int_to_ptr.hbm [resolvable:$true] %s569_s5 }
  0x4d   : > { %v244_v11 = vld [vmem:[%s780_s18 + $0xa8] sm:$0xff]  ;;  %v241_v12 = vld [vmem:[%s780_s18 + $0x90] sm:$0xff]  ;;  %v242_v13 = vld [vmem:[%s780_s18 + $0x98] sm:$0xff]  ;;  %s571_s21 = scalar_lea.hbm %s570_s5, 1  ;;  %p576_p9 = scmp.lt.s32.totalorder %s570_s5, %s858_s3 }
  0x4e   : > { %256 = vmatpush.xpose.msra.mxu0 %v251_v2  ;;  %276 = vmatpush.xpose.msra.mxu1 %v252_v3  ;;  %v239_v14 = vld [vmem:[%s780_s18 + $0x80] sm:$0xff]  ;;  %v240_v15 = vld [vmem:[%s780_s18 + $0x88] sm:$0xff]  ;;  %v237_v16 = vld [vmem:[%s780_s18 + $0x70] sm:$0xff]  ;;  %p572_p6 = scmp.ne.s32.totalorder %s570_s5, %s571_s21  ;;  %p577_p10 = scmp.lt.s32.totalorder %s575_s29, %s571_s21 }
  0x4f   : > { %v238_v17 = vld [vmem:[%s780_s18 + $0x78] sm:$0xff]  ;;  %v235_v18 = vld [vmem:[%s780_s18 + $0x60] sm:$0xff]  ;;  %v236_v19 = vld [vmem:[%s780_s18 + $0x68] sm:$0xff]  ;;  %v296_v36 = vstv %s295_s24 }
  0x50   : > { %v233_v20 = vld [vmem:[%s780_s18 + $0x50] sm:$0xff]  ;;  %v234_v21 = vld [vmem:[%s780_s18 + $0x58] sm:$0xff]  ;;  %v231_v22 = vld [vmem:[%s780_s18 + $0x40] sm:$0xff]  ;;  %p573_p13 = pnand %p572_p6, %p706_p11  ;;  %p578_p1 = por %p577_p10, %p576_p9 }
  0x51   : > { %v232_v23 = vld [vmem:[%s780_s18 + $0x48] sm:$0xff]  ;;  %v229_v24 = vld [vmem:[%s780_s18 + $0x30] sm:$0xff]  ;;  %v230_v25 = vld [vmem:[%s780_s18 + $0x38] sm:$0xff] }
  0x52   : > { %257 = vmatpush.xpose.msra.mxu0 %v249_v4  ;;  %277 = vmatpush.xpose.msra.mxu1 %v250_v5  ;;  %v227_v26 = vld [vmem:[%s780_s18 + $0x20] sm:$0xff]  ;;  %v228_v27 = vld [vmem:[%s780_s18 + $0x28] sm:$0xff]  ;;  %v225_v28 = vld [vmem:[%s780_s18 + $0x10] sm:$0xff]  ;;  %p574_p5 = pneg %p573_p13 }
  0x53   : > { %v226_v29 = vld [vmem:[%s780_s18 + $0x18] sm:$0xff]  ;;  %v223_v30 = vld [vmem:[%s780_s18] sm:$0xff]  ;;  %v224_v31 = vld [vmem:[%s780_s18 + $0x8] sm:$0xff] }
  0x54   : > { %v221_v32 = vld [vmem:[#allocation6] sm:$0xff]  ;;  %v222_v33 = vld [vmem:[#allocation6 + $0x8] sm:$0xff]  ;;  %p579_p0 = pnand %p578_p1, %p574_p5 }
  0x56   : > { %258 = vmatpush.xpose.msra.mxu0 %v247_v6  ;;  %278 = vmatpush.xpose.msra.mxu1 %v248_v7 }
  0x5a   : > { %259 = vmatpush.xpose.msra.mxu0 %v245_v8  ;;  %279 = vmatpush.xpose.msra.mxu1 %v246_v9 }
  0x5e   : > { %260 = vmatpush.xpose.msra.mxu0 %v243_v10  ;;  %280 = vmatpush.xpose.msra.mxu1 %v244_v11 }
  0x62   : > { %261 = vmatpush.xpose.msra.mxu0 %v241_v12  ;;  %281 = vmatpush.xpose.msra.mxu1 %v242_v13 }
  0x66   : > { %262 = vmatpush.xpose.msra.mxu0 %v239_v14  ;;  %282 = vmatpush.xpose.msra.mxu1 %v240_v15 }
  0x6a   : > { %263 = vmatpush.xpose.msra.mxu0 %v237_v16  ;;  %283 = vmatpush.xpose.msra.mxu1 %v238_v17 }
  0x6e   : > { %264 = vmatpush.xpose.msra.mxu0 %v235_v18  ;;  %284 = vmatpush.xpose.msra.mxu1 %v236_v19 }
  0x72   : > { %265 = vmatpush.xpose.msra.mxu0 %v233_v20  ;;  %285 = vmatpush.xpose.msra.mxu1 %v234_v21 }
  0x76   : > { %266 = vmatpush.xpose.msra.mxu0 %v231_v22  ;;  %286 = vmatpush.xpose.msra.mxu1 %v232_v23 }
  0x7a   : > { %267 = vmatpush.xpose.msra.mxu0 %v229_v24  ;;  %287 = vmatpush.xpose.msra.mxu1 %v230_v25 }
  0x7e   : > { %268 = vmatpush.xpose.msra.mxu0 %v227_v26  ;;  %288 = vmatpush.xpose.msra.mxu1 %v228_v27 }
  0x82   : > { %269 = vmatpush.xpose.msra.mxu0 %v225_v28  ;;  %289 = vmatpush.xpose.msra.mxu1 %v226_v29 }
  0x86   : > { %270 = vmatpush.xpose.msra.mxu0 %v223_v30  ;;  %290 = vmatpush.xpose.msra.mxu1 %v224_v31 }
  0x89   : > { %271 = vmatmul.f32.vlgmr.msra.gmra.mxu0 %v221_v32  ;;  %291 = vmatmul.f32.vlgmr.msra.gmra.mxu1 %v222_v33 }
 0x106   : > { %v272_v34 = vpop.f32.mrf.mxu0  ;;  %v292_v35 = vpop.f32.mrf.mxu1 }
 0x107   : > { %v293_v37 = vadd.f32 %v292_v35, %v272_v34 }
 0x109   : > { %v297_v38 = vadd.f32 %v296_v36, %v293_v37 }
 0x10b   : > { %v423_v39 = vmul.f32 -1.442695, %v297_v38 }
 0x10d   : > { %482 = vpow2.f32 %v423_v39 }
 0x113   : > { %v483_v40 = vpop.eup %482 }
 0x114   : > { %v301_v41 = vadd.f32 1.0, %v483_v40 }
 0x116   : > { %484 = vrcp.f32 %v301_v41  ;;  %v313_v45 = vand.u32 2147483648, %v301_v41  ;;  %v311_v47 = vand.u32 2147483647, %v301_v41  ;;  %vm307_vm1 = vweird.f32 %v301_v41 }
 0x118   : > { %v314_v49 = vor.u32 1.1754944e-38, %v313_v45  ;;  %vm312_vm3 = vcmp.eq.f32.partialorder %v311_v47, 8.507059e+37 }
 0x11c   : > { %v485_v42 = vpop.eup %484 }
 0x11d   : > { %v303_v43 = vmul.f32 %v485_v42, %v301_v41  ;;  %vm308_vm0 = vweird.f32 %v485_v42 }
 0x11e   : > { %vm309_vm2 = vmor %vm307_vm1, %vm308_vm0 }
 0x11f   : > { %v304_v44 = vsub.f32 1.0, %v303_v43 }
 0x121   : > { %v305_v46 = vmul.f32 %v485_v42, %v304_v44 }
 0x123   : > { %v306_v48 = vadd.f32 %v485_v42, %v305_v46 }
 0x125   : > { %v310_v50 = vsel %vm309_vm2, %v485_v42, %v306_v48 }
 0x126   : > { %v315_v51 = vsel %vm312_vm3, %v314_v49, %v310_v50 }
 0x127   : > { %317 = vst [vmem:[%s214_s20] sm:$0x1] %v315_v51 }
 0x128   : > { %582 = shalt.err (!%p579_p0)
}
 0x129   : > { %434 = dma.vmem_to_hbm [thread:$0]  (%p706_p11), %s330_s30, 16, %s332_s4, %s319_s2  }
 0x12a PF: > { %p446_p2 = scmp.ge.s32.totalorder %s625_s17, 2  ;;  %s343_s8 = sand.u32 1, %s613_s14  }
 0x12b   : > { %p868_p3 = scmp.ne.s32.totalorder %s863_s26, 0  ;;  %s344_s7 = scalar_lea.sflag [#allocation5], %s343_s8 }
 0x12d   : > { %p441_p7 = pnand %p446_p2, %p868_p3 }
 0x12f   : > { %p442_p8 = pneg %p441_p7 }
 0x131   : > { %608 = dma.done.wait (%p442_p8), %s344_s7, 16  }
 0x132   : > { %610 = vsyncadd (%p442_p8), %s344_s7, 4294967280  ;;  %p18_p4 = scmp.ge.s32.totalorder %s679_s19, 5   ;;  %s869_s14 = smov %s617_s15 }
 0x133   : > { %s870_s15 = smov %s621_s16  ;;  %s871_s16 = smov %s691_s22 }
 0x134   : > { %s872_s17 = smov %s679_s19  ;;  %20 = sbr.rel (!%p18_p4) target bundleno = 8 (0x8), region = 81 }
 0x139   :  { %349 = vsyncpa [#allocation4], 1 }
 0x13a   :  { %351 = vsyncpa [#allocation4 + $0x1], 1 }
 0x13b   :  { %352 = vsyncpa [#allocation7], 1 }
 0x13c   :  { %353 = vsyncpa [#allocation5], 1 }
 0x13d   :  { %355 = vsyncpa [#allocation5 + $0x1], 1 }

</bundles_post_ra>
